<compile_context>
chip_gen: v7x
topology: tpu7x:2x2x1
jax: 0.10.0
libtpu: 0.0.40
codegen_flags: <defaults>
</compile_context>

<pallas_src>
import jax
import jax.numpy as jnp
from jax.experimental import pallas as pl
from jax.experimental.pallas import tpu as pltpu


def _generator_kernel(x_ref,
                      w1_ref, b1_ref,
                      w4_ref, b4_ref,
                      w2_ref, b2_ref,
                      w3_ref, b3_ref,
                      out_ref):
    """Fused concat(z,params)->fc1->tanh->fc4->tanh->fc2->leaky_relu->fc3."""
    # fc1: bf16 MXU matmul, f32 accumulation, f32 bias/activation.
    a1 = jnp.dot(x_ref[...], w1_ref[...],
                 preferred_element_type=jnp.float32) + b1_ref[...]
    h1 = jnp.tanh(a1)
    a4 = jnp.dot(h1.astype(jnp.bfloat16), w4_ref[...],
                 preferred_element_type=jnp.float32) + b4_ref[...]
    h4 = jnp.tanh(a4)
    a2 = jnp.dot(h4.astype(jnp.bfloat16), w2_ref[...],
                 preferred_element_type=jnp.float32) + b2_ref[...]
    h2 = jnp.maximum(a2, 0.01 * a2)            # F.leaky_relu default slope
    out_ref[...] = jnp.dot(h2.astype(jnp.bfloat16), w3_ref[...],
                           preferred_element_type=jnp.float32) + b3_ref[...]


def generator_forward(z, params, weights, *, tile_batch=1024):
    """z: (B, noise_dim), params: (B, X_dim + psi_dim) -> (B, out_dim) f32."""
    (w1, b1), (w2, b2), (w3, b3), (w4, b4) = weights
    B = z.shape[0]
    in_dim = w1.shape[0]
    H = w1.shape[1]
    out_dim = w3.shape[1]

    # Fold the concat into the wrapper: a single (B, in_dim) bf16 activation.
    xc = jnp.concatenate([z, params], axis=1).astype(jnp.bfloat16)

    # bf16 weights for the MXU; f32 biases (accumulation / add stays f32).
    w1b, w2b, w3b, w4b = (w.astype(jnp.bfloat16) for w in (w1, w2, w3, w4))
    b1r = b1.reshape(1, -1).astype(jnp.float32)
    b2r = b2.reshape(1, -1).astype(jnp.float32)
    b3r = b3.reshape(1, -1).astype(jnp.float32)
    b4r = b4.reshape(1, -1).astype(jnp.float32)

    # Batch tiling: multiple of 8 (sublane). Cap the tile so the grid has at
    # least 2 steps when the batch allows it (keeps both v7x TCs busy).
    B8 = pl.cdiv(B, 8) * 8
    tb = max(8, min((tile_batch // 8) * 8, B8))
    if B8 // tb < 2 and B8 >= 16:
        tb = max(8, ((B8 // 2) // 8) * 8)
    B_pad = pl.cdiv(B, tb) * tb
    if B_pad != B:
        xc = jnp.pad(xc, ((0, B_pad - B), (0, 0)))
    grid = (B_pad // tb,)

    def act_spec(d):
        # TODO(synk): if a profile shows exposed DMA, add
        # pipeline_mode=pl.Buffered(3) here and on out_specs.
        return pl.BlockSpec((tb, d), lambda i: (i, 0))

    def resident(shape):
        return pl.BlockSpec(shape, lambda i: (0, 0))

    flops = 2 * B_pad * (in_dim * H + 2 * H * H + H * out_dim)
    transcendentals = 2 * B_pad * H  # two tanh layers
    bytes_accessed = (xc.size * 2                                  # bf16 in
                      + 2 * (w1b.size + w2b.size + w3b.size + w4b.size)
                      + 4 * (b1r.size + b2r.size + b3r.size + b4r.size)
                      + 4 * B_pad * out_dim)                       # f32 out

    out = pl.pallas_call(
        _generator_kernel,
        out_shape=jax.ShapeDtypeStruct((B_pad, out_dim), jnp.float32),
        grid=grid,
        in_specs=[
            act_spec(in_dim),
            resident(w1b.shape), resident(b1r.shape),
            resident(w4b.shape), resident(b4r.shape),
            resident(w2b.shape), resident(b2r.shape),
            resident(w3b.shape), resident(b3r.shape),
        ],
        # True output width: block last dim == full array dim (legal); avoids
        # the 16x write amplification of padding out_dim up to 128 lanes.
        out_specs=pl.BlockSpec((tb, out_dim), lambda i: (i, 0)),
        compiler_params=pltpu.CompilerParams(
            dimension_semantics=("parallel",)),
        cost_estimate=pl.CostEstimate(
            flops=flops,
            transcendentals=transcendentals,
            bytes_accessed=bytes_accessed),
    )(xc, w1b, b1r, w4b, b4r, w2b, b2r, w3b, b3r)

    return out[:B] if B_pad != B else out


def xavier_normal(key, fan_in, fan_out):
    std = jnp.sqrt(2.0 / (fan_in + fan_out))
    # PyTorch weight shape is (out, in); sample there and transpose to (in, out).
    w_torch_layout = std * jax.random.normal(key, (fan_out, fan_in), jnp.float32)
    return w_torch_layout.T


def init_generator_params(key, noise_dim, out_dim, hidden_dim, X_dim, psi_dim):
    in_dim = noise_dim + X_dim + psi_dim
    k1, k2, k3, k4 = jax.random.split(key, 4)
    w1 = xavier_normal(k1, in_dim, hidden_dim)
    b1 = jnp.zeros((hidden_dim,), jnp.float32)
    w2 = xavier_normal(k2, hidden_dim, hidden_dim)
    b2 = jnp.zeros((hidden_dim,), jnp.float32)
    w3 = xavier_normal(k3, hidden_dim, out_dim)
    b3 = jnp.zeros((out_dim,), jnp.float32)
    w4 = xavier_normal(k4, hidden_dim, hidden_dim)
    b4 = jnp.zeros((hidden_dim,), jnp.float32)
    return (w1, b1), (w2, b2), (w3, b3), (w4, b4)


def reference_forward(z, params, weights):
    (w1, b1), (w2, b2), (w3, b3), (w4, b4) = weights
    zc = jnp.concatenate([z, params], axis=1)
    h1 = jnp.tanh(zc @ w1 + b1)
    h4 = jnp.tanh(h1 @ w4 + b4)
    a2 = h4 @ w2 + b2
    h2 = jnp.where(a2 >= 0.0, a2, 0.01 * a2)
    return h2 @ w3 + b3


if __name__ == "__main__":
    # TODO(synk): psi_compressor (self.pc) is stored but never used in forward;
    # nothing to translate.
    noise_dim = 16
    X_dim = 1
    psi_dim = 2
    hidden_dim = 32
    out_dim = 8
    batch = 20          # not a multiple of the tile -> exercises padding path

    key = jax.random.PRNGKey(0)
    kw, kz, kp = jax.random.split(key, 3)

    weights = init_generator_params(kw, noise_dim, out_dim, hidden_dim,
                                    X_dim, psi_dim)
    z = jax.random.normal(kz, (batch, noise_dim), jnp.float32)
    params = jax.random.normal(kp, (batch, X_dim + psi_dim), jnp.float32)

    # Default tile_batch=1024; the >=2-grid-step cap kicks in for this small
    # batch, so the pipelined multi-step grid path is still exercised.
    y = generator_forward(z, params, weights)
    y = jax.block_until_ready(y)

    y_ref = reference_forward(z, params, weights)
    assert y.shape == (batch, out_dim)
    # bf16 MXU inputs with f32 accumulation: relaxed tolerance vs f32 reference.
    assert jnp.allclose(y, y_ref, atol=3e-2, rtol=3e-2), "mismatch vs reference"

    print("KERNEL_OK")
</pallas_src>

<mosaic_0001>
module attributes {stable_mosaic.version = 11 : i64} {
  func.func @_generator_kernel(%arg0: i32, %arg1: memref<8x19xbf16, #tpu.memory_space<vmem>>, %arg2: memref<19x32xbf16, #tpu.memory_space<vmem>>, %arg3: memref<1x32xf32, #tpu.memory_space<vmem>>, %arg4: memref<32x32xbf16, #tpu.memory_space<vmem>>, %arg5: memref<1x32xf32, #tpu.memory_space<vmem>>, %arg6: memref<32x32xbf16, #tpu.memory_space<vmem>>, %arg7: memref<1x32xf32, #tpu.memory_space<vmem>>, %arg8: memref<32x8xbf16, #tpu.memory_space<vmem>>, %arg9: memref<1x8xf32, #tpu.memory_space<vmem>>, %arg10: memref<8x8xf32, #tpu.memory_space<vmem>>) attributes {dimension_semantics = [#tpu.dimension_semantics<parallel>], iteration_bounds = array<i64: 3>, scalar_prefetch = 0 : i64, scratch_operands = 0 : i64, tpu.core_type = #tpu.core_type<tc>, window_params = [{transform_indices = @transform_0, window_bounds = array<i64: 8, 19>}, {pipeline_mode = #tpu.pipeline_mode<synchronous>, transform_indices = @transform_1, window_bounds = array<i64: 19, 32>}, {pipeline_mode = #tpu.pipeline_mode<synchronous>, transform_indices = @transform_2, window_bounds = array<i64: 1, 32>}, {pipeline_mode = #tpu.pipeline_mode<synchronous>, transform_indices = @transform_3, window_bounds = array<i64: 32, 32>}, {pipeline_mode = #tpu.pipeline_mode<synchronous>, transform_indices = @transform_4, window_bounds = array<i64: 1, 32>}, {pipeline_mode = #tpu.pipeline_mode<synchronous>, transform_indices = @transform_5, window_bounds = array<i64: 32, 32>}, {pipeline_mode = #tpu.pipeline_mode<synchronous>, transform_indices = @transform_6, window_bounds = array<i64: 1, 32>}, {pipeline_mode = #tpu.pipeline_mode<synchronous>, transform_indices = @transform_7, window_bounds = array<i64: 32, 8>}, {pipeline_mode = #tpu.pipeline_mode<synchronous>, transform_indices = @transform_8, window_bounds = array<i64: 1, 8>}, {transform_indices = @transform_9, window_bounds = array<i64: 8, 8>}]} {
    %c0 = arith.constant 0 : index
    %c0_0 = arith.constant 0 : index
    %0 = vector.load %arg1[%c0, %c0_0] : memref<8x19xbf16, #tpu.memory_space<vmem>>, vector<8x19xbf16>
    %c0_1 = arith.constant 0 : index
    %c0_2 = arith.constant 0 : index
    %1 = vector.load %arg2[%c0_1, %c0_2] : memref<19x32xbf16, #tpu.memory_space<vmem>>, vector<19x32xbf16>
    %cst = arith.constant dense<0.000000e+00> : vector<8x32xf32>
    %2 = tpu.matmul %0, %1, %cst {dimension_numbers = #tpu.dot_dimension_numbers<[1], [0], [0], [1], [0, 0, 1, 1], [], []>} : vector<8x19xbf16>, vector<19x32xbf16>, vector<8x32xf32> -> vector<8x32xf32>
    %c0_3 = arith.constant 0 : index
    %c0_4 = arith.constant 0 : index
    %3 = vector.load %arg3[%c0_3, %c0_4] : memref<1x32xf32, #tpu.memory_space<vmem>>, vector<1x32xf32>
    %4 = vector.broadcast %3 : vector<1x32xf32> to vector<8x32xf32>
    %5 = arith.addf %2, %4 : vector<8x32xf32>
    %6 = math.tanh %5 : vector<8x32xf32>
    %7 = arith.truncf %6 : vector<8x32xf32> to vector<8x32xbf16>
    %c0_5 = arith.constant 0 : index
    %c0_6 = arith.constant 0 : index
    %8 = vector.load %arg4[%c0_5, %c0_6] : memref<32x32xbf16, #tpu.memory_space<vmem>>, vector<32x32xbf16>
    %cst_7 = arith.constant dense<0.000000e+00> : vector<8x32xf32>
    %9 = tpu.matmul %7, %8, %cst_7 {dimension_numbers = #tpu.dot_dimension_numbers<[1], [0], [0], [1], [0, 0, 1, 1], [], []>} : vector<8x32xbf16>, vector<32x32xbf16>, vector<8x32xf32> -> vector<8x32xf32>
    %c0_8 = arith.constant 0 : index
    %c0_9 = arith.constant 0 : index
    %10 = vector.load %arg5[%c0_8, %c0_9] : memref<1x32xf32, #tpu.memory_space<vmem>>, vector<1x32xf32>
    %11 = vector.broadcast %10 : vector<1x32xf32> to vector<8x32xf32>
    %12 = arith.addf %9, %11 : vector<8x32xf32>
    %13 = math.tanh %12 : vector<8x32xf32>
    %14 = arith.truncf %13 : vector<8x32xf32> to vector<8x32xbf16>
    %c0_10 = arith.constant 0 : index
    %c0_11 = arith.constant 0 : index
    %15 = vector.load %arg6[%c0_10, %c0_11] : memref<32x32xbf16, #tpu.memory_space<vmem>>, vector<32x32xbf16>
    %cst_12 = arith.constant dense<0.000000e+00> : vector<8x32xf32>
    %16 = tpu.matmul %14, %15, %cst_12 {dimension_numbers = #tpu.dot_dimension_numbers<[1], [0], [0], [1], [0, 0, 1, 1], [], []>} : vector<8x32xbf16>, vector<32x32xbf16>, vector<8x32xf32> -> vector<8x32xf32>
    %c0_13 = arith.constant 0 : index
    %c0_14 = arith.constant 0 : index
    %17 = vector.load %arg7[%c0_13, %c0_14] : memref<1x32xf32, #tpu.memory_space<vmem>>, vector<1x32xf32>
    %18 = vector.broadcast %17 : vector<1x32xf32> to vector<8x32xf32>
    %19 = arith.addf %16, %18 : vector<8x32xf32>
    %cst_15 = arith.constant 0.00999999977 : f32
    %20 = vector.broadcast %cst_15 : f32 to vector<8x32xf32>
    %21 = arith.mulf %20, %19 : vector<8x32xf32>
    %22 = arith.maximumf %19, %21 : vector<8x32xf32>
    %23 = arith.truncf %22 : vector<8x32xf32> to vector<8x32xbf16>
    %c0_16 = arith.constant 0 : index
    %c0_17 = arith.constant 0 : index
    %24 = vector.load %arg8[%c0_16, %c0_17] : memref<32x8xbf16, #tpu.memory_space<vmem>>, vector<32x8xbf16>
    %cst_18 = arith.constant dense<0.000000e+00> : vector<8x8xf32>
    %25 = tpu.matmul %23, %24, %cst_18 {dimension_numbers = #tpu.dot_dimension_numbers<[1], [0], [0], [1], [0, 0, 1, 1], [], []>} : vector<8x32xbf16>, vector<32x8xbf16>, vector<8x8xf32> -> vector<8x8xf32>
    %c0_19 = arith.constant 0 : index
    %c0_20 = arith.constant 0 : index
    %26 = vector.load %arg9[%c0_19, %c0_20] : memref<1x8xf32, #tpu.memory_space<vmem>>, vector<1x8xf32>
    %27 = vector.broadcast %26 : vector<1x8xf32> to vector<8x8xf32>
    %28 = arith.addf %25, %27 : vector<8x8xf32>
    %c0_21 = arith.constant 0 : index
    %c0_22 = arith.constant 0 : index
    %29 = vector.load %arg10[%c0_21, %c0_22] : memref<8x8xf32, #tpu.memory_space<vmem>>, vector<8x8xf32>
    tpu.vector_store %arg10[%c0_21, %c0_22], %28 {strides = array<i32>} : memref<8x8xf32, #tpu.memory_space<vmem>>, vector<8x8xf32>,
    return
  }
  func.func @transform_0(%arg0: i32) -> (i32, i32) {
    %c0_i32 = arith.constant 0 : i32
    %c0_i32_0 = arith.constant 0 : i32
    return %arg0, %c0_i32 : i32, i32
  }
  func.func @transform_1(%arg0: i32) -> (i32, i32) {
    %c0_i32 = arith.constant 0 : i32
    %c0_i32_0 = arith.constant 0 : i32
    %c0_i32_1 = arith.constant 0 : i32
    return %c0_i32, %c0_i32_0 : i32, i32
  }
  func.func @transform_2(%arg0: i32) -> (i32, i32) {
    %c0_i32 = arith.constant 0 : i32
    %c0_i32_0 = arith.constant 0 : i32
    %c0_i32_1 = arith.constant 0 : i32
    return %c0_i32, %c0_i32_0 : i32, i32
  }
  func.func @transform_3(%arg0: i32) -> (i32, i32) {
    %c0_i32 = arith.constant 0 : i32
    %c0_i32_0 = arith.constant 0 : i32
    %c0_i32_1 = arith.constant 0 : i32
    return %c0_i32, %c0_i32_0 : i32, i32
  }
  func.func @transform_4(%arg0: i32) -> (i32, i32) {
    %c0_i32 = arith.constant 0 : i32
    %c0_i32_0 = arith.constant 0 : i32
    %c0_i32_1 = arith.constant 0 : i32
    return %c0_i32, %c0_i32_0 : i32, i32
  }
  func.func @transform_5(%arg0: i32) -> (i32, i32) {
    %c0_i32 = arith.constant 0 : i32
    %c0_i32_0 = arith.constant 0 : i32
    %c0_i32_1 = arith.constant 0 : i32
    return %c0_i32, %c0_i32_0 : i32, i32
  }
  func.func @transform_6(%arg0: i32) -> (i32, i32) {
    %c0_i32 = arith.constant 0 : i32
    %c0_i32_0 = arith.constant 0 : i32
    %c0_i32_1 = arith.constant 0 : i32
    return %c0_i32, %c0_i32_0 : i32, i32
  }
  func.func @transform_7(%arg0: i32) -> (i32, i32) {
    %c0_i32 = arith.constant 0 : i32
    %c0_i32_0 = arith.constant 0 : i32
    %c0_i32_1 = arith.constant 0 : i32
    return %c0_i32, %c0_i32_0 : i32, i32
  }
  func.func @transform_8(%arg0: i32) -> (i32, i32) {
    %c0_i32 = arith.constant 0 : i32
    %c0_i32_0 = arith.constant 0 : i32
    %c0_i32_1 = arith.constant 0 : i32
    return %c0_i32, %c0_i32_0 : i32, i32
  }
  func.func @transform_9(%arg0: i32) -> (i32, i32) {
    %c0_i32 = arith.constant 0 : i32
    %c0_i32_0 = arith.constant 0 : i32
    return %arg0, %c0_i32 : i32, i32
  }
}

</mosaic_0001>

<bundles_post_ra>
// kernel: tpu_custom_call.1
= control target key start
LH: loop header
LB: loop body
LE: loop exit
PB: predicated region body
PF: predicated region fallthrough
CT: control target
= control target key end

     0   :  { %14 = vsyncpa [#allocation3], 0  ;;  %s1188_s0 = inlined_call_operand.hbm [shape: bf16[24,19], index: 0, kind: input, shape index: {}]   ;;  %s1189_s1 = inlined_call_operand.hbm [shape: bf16[19,32], index: 1, kind: input, shape index: {}]   ;;  %s1190_s2 = inlined_call_operand.vmem [shape: f32[1,32], index: 2, kind: input, shape index: {}]   ;;  %s1191_s3 = inlined_call_operand.vmem [shape: bf16[32,32], index: 3, kind: input, shape index: {}]   ;;  %s1192_s4 = inlined_call_operand.vmem [shape: f32[1,32], index: 4, kind: input, shape index: {}]   ;;  %s1193_s5 = inlined_call_operand.vmem [shape: bf16[32,32], index: 5, kind: input, shape index: {}]   ;;  %s1194_s6 = inlined_call_operand.vmem [shape: f32[1,32], index: 6, kind: input, shape index: {}]   ;;  %s1195_s7 = inlined_call_operand.vmem [shape: bf16[32,8], index: 7, kind: input, shape index: {}]   ;;  %s1196_s8 = inlined_call_operand.vmem [shape: f32[1,8], index: 8, kind: input, shape index: {}]   ;;  %s1197_s9 = inlined_call_operand.vmem [shape: f32[24,8], index: 9, kind: output, shape index: {}]  }
   0x1   :  { %16 = vsyncpa [#allocation3 + $0x1], 0 }
   0x2   :  { %17 = vsyncpa [#allocation5], 0  ;;  %s1012_s30 = smov 0   ;;  %s1014_s10 = smov 0  }
   0x3   :  { %s1016_s11 = smov 0   ;;  %s1018_s12 = smov 0  }
   0x4 LB: > { %s1031_s13 = sadd.s32 4294967295, %s953_s12   ;;  %p43_p0 = scmp.ne.s32.totalorder %s945_s10, %s941_s30  ;;  %s953_s12 = sphi %s1018_s12, %s1212_s12   ;;  %s949_s11 = sphi %s1016_s11, %s1215_s11   ;;  %s945_s10 = sphi %s1014_s10, %s1214_s10   ;;  %s941_s30 = sphi %s1012_s30, %s1213_s30  }
   0x5   : > { %p1198_p1 = scmp.eq.s32.totalorder %s1031_s13, 0  ;;  %p719_p2 = scmp.ge.s32.totalorder %s953_s12, 1 }
   0x6   : > { %p248_p3 = scmp.lt.s32.totalorder %s953_s12, 4  ;;  %s955_s16 = smov [#allocation4]  }
   0x7   : > { %p1039_p4 = por %p1198_p1, %p43_p0  ;;  %s260_s17 = sshll.u32 %s955_s16, 4  ;;  %s261_s17 = int_to_ptr.vmem [resolvable:$true] %s260_s17 }
   0x8   : > { %p1043_p5 = pnand %p719_p2, %p248_p3  ;;  %s1056_s19 = sadd.s32 1, %s953_s12  }
   0x9   : > { %s1203_s14 = scalar_select %p1039_p4, 1, 0 }
   0xa   : > { %s1204_s15 = scalar_select %p1043_p5, 1, 0 }
   0xb   : > { %p796_p6 = pneg %p1043_p5  ;;  %1206 = sst [smem:[#allocation8_spill]] %s1056_s19 }
   0xc   : > { %s30_s20 = sadd.s32 1, %s949_s11  ;;  %s27_s21 = ssub.s32 %s953_s12, %s1056_s19 }
   0xd   : > { %p1051_p7 = pnand %p796_p6, %p1198_p1  ;;  %s857_s24 = scalar_lea.hbm %s1189_s1, 192 }
   0xe   : > { %p858_p8 = scmp.ne.s32.totalorder %s1189_s1, %s857_s24  ;;  %p864_p12 = scmp.lt.u32.totalorder %s857_s24, %s1189_s1 }
   0xf   : > { %p859_p9 = pneg %p1051_p7 }
  0x11   : > { %p860_p10 = pnand %p859_p9, %p858_p8 }
  0x13   : > { %p861_p11 = pneg %p860_p10 }
  0x15   : > { %p866_p13 = pnand %p864_p12, %p861_p11 }
  0x17   : > { %869 = shalt.err (!%p866_p13)
}
  0x18   : > { %s870_s29 = scalar_lea.vmem %s261_s17, 192  ;;  %p878_p6 = scmp.lt.s32.totalorder %s261_s17, %s261_s17 }
  0x19   : > { %p871_p0 = scmp.ne.s32.totalorder %s261_s17, %s870_s29  ;;  %p879_p1 = scmp.lt.s32.totalorder %s870_s29, %s870_s29 }
  0x1b   : > { %p873_p2 = pnand %p871_p0, %p859_p9  ;;  %p880_p4 = por %p879_p1, %p878_p6 }
  0x1d   : > { %p874_p3 = pneg %p873_p2 }
  0x1f   : > { %p881_p5 = pnand %p880_p4, %p874_p3 }
  0x21   : > { %884 = shalt.err (!%p881_p5)
}
  0x22   : > { %s956_s30 = smov 64   ;;  %s957_s16 = smov 4  }
  0x23   : > { %799 = dma.hbm_to_vmem [thread:$0]  (!%p1051_p7), %s1189_s1, 192, %s261_s17, [#allocation5], %s956_s30, %s956_s30, %s957_s16  }
  0x24   : > { %p28_p8 = scmp.eq.s32.totalorder %s27_s21, 0  ;;  %p37_p9 = scmp.ne.s32.totalorder %s949_s11, %s945_s10 }
  0x25   : > { %p38_p1 = scmp.eq.s32.totalorder %s953_s12, 0  ;;  %p805_p4 = scmp.lt.s32.totalorder %s953_s12, 3 }
  0x26   : > { %s1082_s24 = scalar_select %p28_p8, %s949_s11, %s30_s20  }
  0x27   : > { %p39_p5 = por %p38_p1, %p37_p9  ;;  %s295_s25 = sand.u32 1, %s949_s11  }
  0x28   : > { %s722_s26 = sshll.u32 %s295_s25, 2  ;;  %s723_s27 = sshll.u32 %s953_s12, 6 }
  0x29   : > { %s1089_s19 = scalar_lea.hbm %s1188_s0, %s723_s27  ;;  %s299_s17 = scalar_lea.vmem [#allocation2], %s722_s26 }
  0x2a   : > { %s306_s18 = sshll.u32 %s299_s17, 4  ;;  %p1093_p7 = pnand %p805_p4, %p39_p5  ;;  %s1091_s18 = int_to_ptr.vmem [resolvable:$true] %s306_s18 }
  0x2b   : > { %s296_s12 = scalar_lea.sflag [#allocation3], %s295_s25  ;;  %s885_s21 = scalar_lea.hbm %s1089_s19, 64 }
  0x2c   : > { %p886_p10 = scmp.ne.s32.totalorder %s1089_s19, %s885_s21  ;;  %p887_p11 = pneg %p1093_p7 }
  0x2d   : > { %s890_s22 = scalar_lea.hbm %s1188_s0, 192  ;;  %p891_p0 = scmp.lt.u32.totalorder %s1089_s19, %s1188_s0 }
  0x2e   : > { %p888_p12 = pnand %p887_p11, %p886_p10  ;;  %p892_p2 = scmp.lt.u32.totalorder %s890_s22, %s885_s21 }
  0x2f   : > { %p894_p6 = scmp.lt.u32.totalorder %s885_s21, %s1089_s19 }
  0x30   : > { %p889_p13 = pneg %p888_p12  ;;  %p893_p3 = por %p892_p2, %p891_p0 }
  0x32   : > { %p895_p8 = por %p894_p6, %p893_p3 }
  0x34   : > { %p896_p9 = pnand %p895_p8, %p889_p13 }
  0x36   : > { %899 = shalt.err (!%p896_p9)
}
  0x37   : > { %s900_s25 = scalar_lea.vmem %s1091_s18, 64  ;;  %s958_s27 = smov [#allocation2]  }
  0x38   : > { %p901_p1 = scmp.ne.s32.totalorder %s1091_s18, %s900_s25  ;;  %s905_s28 = sshll.u32 %s958_s27, 4  ;;  %s906_s28 = int_to_ptr.vmem [resolvable:$false] %s905_s28 }
  0x39   : > { %s907_s29 = scalar_lea.vmem %s906_s28, 128  ;;  %p908_p10 = scmp.lt.s32.totalorder %s1091_s18, %s906_s28 }
  0x3a   : > { %p903_p4 = pnand %p901_p1, %p887_p11  ;;  %p909_p12 = scmp.lt.s32.totalorder %s907_s29, %s900_s25 }
  0x3c   : > { %p904_p5 = pneg %p903_p4  ;;  %p910_p0 = por %p909_p12, %p908_p10 }
  0x3e   : > { %p911_p2 = pnand %p910_p0, %p904_p5 }
  0x40   : > { %914 = shalt.err (!%p911_p2)
}
  0x41   : > { %803 = dma.hbm_to_vmem [thread:$0]  (!%p1093_p7), %s1089_s19, 64, %s1091_s18, %s296_s12  }
  0x42   : > { %p1208_p13 = scmp.ne.s32.totalorder %s1204_s15, 0 }
  0x43   : > { %s317_s17 = sand.u32 (!%p1208_p13), 1, %s945_s10   ;;  %p1209_p11 = scmp.ne.s32.totalorder (!%p1208_p13), %s1203_s14, 0 }
  0x44   : > { %315 = sbr.rel (%p1208_p13) target bundleno = 978 (0x3d2), region = 56  ;;  %s725_s21 = sshll.u32 (!%p1208_p13), %s317_s17, 2 }
  0x45   : > { %s318_s30 = scalar_lea.sflag (!%p1208_p13), [#allocation3], %s317_s17  ;;  %s321_s16 = scalar_lea.vmem (!%p1208_p13), [#allocation2], %s725_s21 }
  0x4b   : > { %932 = dma.done.wait (%p1209_p11), %s318_s30, 64  }
  0x4c   : > { %934 = vsyncadd (%p1209_p11), %s318_s30, 4294967232  ;;  %p1210_p3 = scmp.eq.s32.totalorder %s1031_s13, 0 }
  0x4e   : > { %936 = dma.done.wait (%p1210_p3), [#allocation5], 192   ;;  %p1211_p6 = pmov %p1210_p3 }
  0x4f   : > { %v959_v0 = vmov 0.0   ;;  %vm388_vm0 = vcmask 1040384   ;;  %vm960_vm1 = vmmov 0   ;;  %vm389_vm2 = vcmask 1041408   ;;  %v845_v3 = vld [vmem:[#allocation4] sm:$0xff]   ;;  %v847_v8 = vld [vmem:[%s1191_s3] sm:$0xff]  }
  0x50   : > { %938 = vsyncadd (%p1211_p6), [#allocation5], 4294967104  ;;  %758 = vmatprep.subr.bf16.mxu0 %v959_v0  ;;  %766 = vmatprep.subr.bf16.mxu1 %v959_v0  ;;  %v961_v1 = vmov 65535   ;;  %v846_v5 = vld [vmem:[#allocation4 + $0x8] ss:$0 sps:$4 sm:$0x33]  }
  0x51   : > { %762 = vmatprep.mubr.msk.bf16.mxu0 %vm960_vm1, %v959_v0  ;;  %770 = vmatprep.mubr.msk.bf16.mxu1 %vm960_vm1, %v959_v0  ;;  %v390_v2 = vsel %vm388_vm0, 4294967295, %v961_v1  ;;  %vm384_vm3 = vcmask 154624   ;;  %v364_v7 = vld [vmem:[%s321_s16] sm:$0xf]  ;;  %v848_v9 = vld [vmem:[%s1191_s3 + $0x8] sm:$0xff]   ;;  %vm460_vm4 = vcmask 261120  }
  0x52   : > { %v391_v4 = vsel %vm389_vm2, %v390_v2, 0  ;;  %759 = vmatpush3.bf16.msra.mxu0 %v845_v3  ;;  %767 = vmatpush3.bf16.msra.mxu1 %v847_v8  ;;  %v728_v10 = vld [vmem:[%s1190_s2] ss:$0 sm:$0xff]  ;;  %v850_v19 = vld [vmem:[%s1193_s5 + $0x8] sm:$0xff]   ;;  %p359_p7 = scmp.lt.s32.totalorder %s1031_s13, 2  ;;  %vm641_vm5 = vcmask 64512  }
  0x53   : > { %760 = vmatprep.subr.bf16.mxu0 %v959_v0  ;;  %v393_v6 = vand.u32 %v846_v5, %v391_v4  ;;  %768 = vmatprep.subr.bf16.mxu1 %v959_v0  ;;  %v849_v18 = vld [vmem:[%s1193_s5] sm:$0xff]   ;;  %v852_v29 = vld [vmem:[%s1195_s7 + $0x8] sm:$0xff]  }
  0x54   : > { %v732_v20 = vld [vmem:[%s1192_s4] ss:$0 sm:$0xff]  ;;  %s1217_s13 = smov (!%p359_p7, %s1031_s13), 2 }
  0x55   : > { %v851_v28 = vld [vmem:[%s1195_s7] sm:$0xff]   ;;  %s727_s15 = sshll.u32 %s1217_s13, 3 }
  0x56   : > { %761 = vmatpush3.bf16.msra.mxu0 %v393_v6  ;;  %769 = vmatpush3.bf16.msra.mxu1 %v848_v9  ;;  %v736_v30 = vld [vmem:[%s1194_s6] ss:$0 sm:$0xff]  ;;  %s362_s22 = scalar_lea.vmem %s1197_s9, %s727_s15 }
  0x57   : > { %774 = vmatprep.subr.bf16.mxu0 %v959_v0  ;;  %782 = vmatprep.subr.bf16.mxu1 %v959_v0  ;;  %v740_v39 = vld [vmem:[%s1196_s8] ss:$0 sm:$0xff] }
  0x59   : > { %763 = vmatmul.mubr.msk.bf16.vlgmr.msra.gmra.mrb[0].mxu0 %vm384_vm3, %v364_v7 }
  0x5a   : > { %778 = vmatprep.mubr.msk.bf16.mxu0 %vm960_vm1, %v959_v0  ;;  %775 = vmatpush3.bf16.msra.mxu0 %v849_v18 }
  0x5b   : > { %776 = vmatprep.subr.bf16.mxu0 %v959_v0 }
  0x5e   : > { %777 = vmatpush3.bf16.msra.mxu0 %v850_v19 }
 0x12c   : > { %v429_v11 = vpop.f32.mrb[0].mxu0 }
 0x12d   : > { %v430_v12 = vadd.f32 %v728_v10, %v429_v11  ;;  %v764_v13 = vpop.f32.mrb[1].mxu0 }
 0x12e   : > { %v432_v14 = vpop.f32.mrb[2].mxu0 }
 0x12f   : > { %853 = vtanh.f32 %v430_v12  ;;  %v765_v15 = vpop.f32.mrb[3].mxu0 }
 0x139   : > { %v854_v16 = vpop.eup %853 }
 0x13a   : > { %v436_v17 = vpack.c.bf16 %v854_v16, %v854_v16 }
 0x13c   : > { %771 = vmatmul.mubr.msk.bf16.vlgmr.msra.gmra.mrb[0].mxu1 %vm460_vm4, %v436_v17 }
 0x13d   : > { %786 = vmatprep.mubr.msk.bf16.mxu1 %vm960_vm1, %v959_v0  ;;  %783 = vmatpush3.bf16.msra.mxu1 %v851_v28 }
 0x13e   : > { %784 = vmatprep.subr.bf16.mxu1 %v959_v0 }
 0x141   : > { %785 = vmatpush3.bf16.msra.mxu1 %v852_v29 }
 0x20f   : > { %v498_v21 = vpop.f32.mrb[0].mxu1 }
 0x210   : > { %v499_v22 = vadd.f32 %v732_v20, %v498_v21  ;;  %v772_v23 = vpop.f32.mrb[1].mxu1 }
 0x211   : > { %v501_v24 = vpop.f32.mrb[2].mxu1 }
 0x212   : > { %855 = vtanh.f32 %v499_v22  ;;  %v773_v25 = vpop.f32.mrb[3].mxu1 }
 0x21c   : > { %v856_v26 = vpop.eup %855 }
 0x21d   : > { %v505_v27 = vpack.c.bf16 %v856_v26, %v856_v26 }
 0x21f   : > { %779 = vmatmul.mubr.msk.bf16.vlgmr.msra.gmra.mrb[4].mxu0 %vm460_vm4, %v505_v27 }
 0x2f2   : > { %v566_v31 = vpop.f32.mrb[4].mxu0 }
 0x2f3   : > { %v567_v32 = vadd.f32 %v736_v30, %v566_v31  ;;  %v780_v33 = vpop.f32.mrb[5].mxu0 }
 0x2f4   : > { %v569_v34 = vpop.f32.mrb[6].mxu0 }
 0x2f5   : > { %v572_v35 = vmul.f32 0.01, %v567_v32  ;;  %v781_v36 = vpop.f32.mrb[7].mxu0 }
 0x2f7   : > { %v573_v37 = vmax.f32 %v567_v32, %v572_v35 }
 0x2f9   : > { %v574_v38 = vpack.c.bf16 %v573_v37, %v573_v37 }
 0x2fb   : > { %787 = vmatmul.mubr.msk.bf16.vlgmr.msra.gmra.mrb[4].mxu1 %vm460_vm4, %v574_v38 }
 0x3ce   : > { %v635_v40 = vpop.f32.mrb[4].mxu1 }
 0x3cf   : > { %v636_v41 = vadd.f32 %v740_v39, %v635_v40  ;;  %v788_v42 = vpop.f32.mrb[5].mxu1 }
 0x3d0   : > { %v638_v43 = vpop.f32.mrb[6].mxu1 }
 0x3d1   : > { %642 = vst.msk [vmem:[%s362_s22] sm:$0xff] %vm641_vm5, %v636_v41  ;;  %v789_v44 = vpop.f32.mrb[7].mxu1 }
 0x3d2 PF: > { %s1212_s12 = sld [smem:[#allocation8_spill]]  ;;  %s1213_s30 = smov %s945_s10 }
 0x3d3   : > { %s1214_s10 = smov %s949_s11  ;;  %s1215_s11 = smov %s1082_s24 }
 0x3d8   : > { %p20_p8 = scmp.ge.s32.totalorder %s1212_s12, 5  }
 0x3da   :  { %22 = sbr.rel (!%p20_p8) target bundleno = 4 (0x4), region = 100 }
 0x3e1   :  { %662 = vsyncpa [#allocation3], 1 }
 0x3e2   :  { %664 = vsyncpa [#allocation3 + $0x1], 1 }
 0x3e3   :  { %665 = vsyncpa [#allocation5], 1 }

</bundles_post_ra>
